<compile_context>
chip_gen: v6e
topology: v6e:2x2x1
jax: 0.10.0
libtpu: 0.0.40
codegen_flags: <defaults>
</compile_context>

<pallas_src>
import math
from functools import partial

import jax
import jax.numpy as jnp
from jax import lax
from jax.experimental import pallas as pl
from jax.experimental.pallas import tpu as pltpu


def _round_up(x, m):
    return ((x + m - 1) // m) * m


# ----------------------------------------------------------------------------
# Kernel 1: row-tiled matmul + bias (patch-embed)
# ----------------------------------------------------------------------------
def _matmul_bias_kernel(x_ref, w_ref, b_ref, o_ref):
    o_ref[...] = (
        jnp.dot(x_ref[...], w_ref[...], preferred_element_type=jnp.float32)
        + b_ref[...]
    ).astype(o_ref.dtype)


def matmul_bias(x, w, b, *, out_dtype=jnp.float32, row_tile=512):
    # x: [M, K] (bf16), w: [K, N] (bf16), b: [1, N] (f32) -> [M, N] out_dtype
    M, K = x.shape
    N = w.shape[1]
    tm = min(row_tile, _round_up(M, 8))
    Mp = _round_up(M, tm)                 # pad rows instead of tm=M fallback
    if Mp != M:
        x = jnp.pad(x, ((0, Mp - M), (0, 0)))
    out = pl.pallas_call(
        _matmul_bias_kernel,
        out_shape=jax.ShapeDtypeStruct((Mp, N), out_dtype),
        grid=(Mp // tm,),
        in_specs=[
            pl.BlockSpec((tm, K), lambda i: (i, 0)),   # tiled rows (pipelined)
            pl.BlockSpec((K, N), lambda i: (0, 0)),    # weight resident
            pl.BlockSpec((1, N), lambda i: (0, 0)),    # bias resident
        ],
        out_specs=pl.BlockSpec((tm, N), lambda i: (i, 0)),
        compiler_params=pltpu.CompilerParams(dimension_semantics=("parallel",)),
    )(x, w, b)
    return out[:M] if Mp != M else out


# ----------------------------------------------------------------------------
# Kernel 2: fused ViT transformer block (LN -> MHA -> res -> LN -> MLP -> res)
# grid = (B,) — one batch element per grid step; all block weights fit in VMEM
# at these dims.  Residual stream lives in bf16 in HBM; f32 inside.
# ----------------------------------------------------------------------------
def _layer_norm(x, g, b, eps=1e-6):   # eps=1e-6 matches SAM's ViT LayerNorm
    mu = jnp.mean(x, axis=-1, keepdims=True)
    var = jnp.mean((x - mu) ** 2, axis=-1, keepdims=True)
    return (x - mu) * lax.rsqrt(var + eps) * g + b


def _vit_block_kernel(
    x_ref,
    ln1g_ref, ln1b_ref,
    wqkv_ref, bqkv_ref,
    wproj_ref, bproj_ref,
    ln2g_ref, ln2b_ref,
    w1_ref, b1_ref,
    w2_ref, b2_ref,
    o_ref,
    *, num_heads,
):
    x = x_ref[0].astype(jnp.float32)               # [N, D] f32 residual stream
    N, D = x.shape
    hd = D // num_heads

    # --- attention branch: one fused lane-dense QKV GEMM, heads tile-aligned ---
    h = _layer_norm(x, ln1g_ref[...], ln1b_ref[...])
    qkv = jnp.dot(h.astype(jnp.bfloat16), wqkv_ref[...],
                  preferred_element_type=jnp.float32) + bqkv_ref[...]   # [N, 3D]
    # 1/sqrt(hd) already folded into the q columns of wqkv / bqkv at init time.
    q = qkv[:, 0 * D:1 * D].reshape(N, num_heads, hd).transpose(1, 0, 2)  # [H,N,hd]
    k = qkv[:, 1 * D:2 * D].reshape(N, num_heads, hd).transpose(1, 0, 2)
    v = qkv[:, 2 * D:3 * D].reshape(N, num_heads, hd).transpose(1, 0, 2)

    s = jnp.einsum("hnd,hmd->hnm", q.astype(jnp.bfloat16), k.astype(jnp.bfloat16),
                   preferred_element_type=jnp.float32)                  # [H,N,N]
    s = s - jnp.max(s, axis=-1, keepdims=True)
    p = jnp.exp(s)
    p = p * pl.reciprocal(jnp.sum(p, axis=-1, keepdims=True), approx=True)

    o = jnp.einsum("hnm,hmd->hnd", p.astype(jnp.bfloat16), v.astype(jnp.bfloat16),
                   preferred_element_type=jnp.float32)                  # [H,N,hd]
    o = o.transpose(1, 0, 2).reshape(N, D)         # merge heads (tile-aligned)
    attn = jnp.dot(o.astype(jnp.bfloat16), wproj_ref[...],
                   preferred_element_type=jnp.float32) + bproj_ref[...]  # [N,D]
    x = x + attn

    # --- MLP branch (bf16 matmuls, f32 accumulate, exact erf GELU) ---
    h2 = _layer_norm(x, ln2g_ref[...], ln2b_ref[...])
    a = jnp.dot(h2.astype(jnp.bfloat16), w1_ref[...],
                preferred_element_type=jnp.float32) + b1_ref[...]
    # exact erf GELU to match PyTorch nn.GELU default (on v5e, approximate=True
    # would move work from VALU to EUP at the cost of numeric parity).
    a = jax.nn.gelu(a, approximate=False)
    m = jnp.dot(a.astype(jnp.bfloat16), w2_ref[...],
                preferred_element_type=jnp.float32) + b2_ref[...]

    o_ref[0] = (x + m).astype(o_ref.dtype)         # bf16 residual back to HBM


def vit_block(x, p, num_heads):
    # x: [B, N, D] bf16
    B, N, D = x.shape
    Dh = p["w1"].shape[1]
    const2 = lambda s: pl.BlockSpec(s, lambda b: (0, 0))
    return pl.pallas_call(
        partial(_vit_block_kernel, num_heads=num_heads),
        out_shape=jax.ShapeDtypeStruct((B, N, D), jnp.bfloat16),
        grid=(B,),
        in_specs=[
            pl.BlockSpec((1, N, D), lambda b: (b, 0, 0)),
            const2((1, D)), const2((1, D)),            # ln1
            const2((D, 3 * D)), const2((1, 3 * D)),    # fused qkv
            const2((D, D)), const2((1, D)),            # merged proj
            const2((1, D)), const2((1, D)),            # ln2
            const2((D, Dh)), const2((1, Dh)),          # mlp up
            const2((Dh, D)), const2((1, D)),           # mlp down
        ],
        out_specs=pl.BlockSpec((1, N, D), lambda b: (b, 0, 0)),
        compiler_params=pltpu.CompilerParams(
            dimension_semantics=("parallel",),
            vmem_limit_bytes=32 * 1024 * 1024,
        ),
    )(
        x,
        p["ln1_g"], p["ln1_b"],
        p["w_qkv"], p["b_qkv"],
        p["w_proj"], p["b_proj"],
        p["ln2_g"], p["ln2_b"],
        p["w1"], p["b1"],
        p["w2"], p["b2"],
    )


# ----------------------------------------------------------------------------
# Kernel 3: neck (1x1 conv == linear) with in-kernel transpose to channels-first
# output block is [out_chans, N] — lane axis = N (multiple of 128), so the final
# NCHW image_embedding is a pure reshape, not an XLA transpose round-trip.
# ----------------------------------------------------------------------------
def _neck_kernel(x_ref, w_ref, b_ref, o_ref):
    y = jnp.dot(x_ref[0], w_ref[...], preferred_element_type=jnp.float32) \
        + b_ref[...]                                   # [N, OC] f32
    o_ref[0] = y.T.astype(o_ref.dtype)                 # [OC, N]


def neck(tokens, w, b):
    # tokens: [B, N, D] bf16, w: [D, OC] bf16, b: [1, OC] f32 -> [B, OC, N] f32
    B, N, D = tokens.shape
    OC = w.shape[1]
    return pl.pallas_call(
        _neck_kernel,
        out_shape=jax.ShapeDtypeStruct((B, OC, N), jnp.float32),
        grid=(B,),
        in_specs=[
            pl.BlockSpec((1, N, D), lambda b_: (b_, 0, 0)),
            pl.BlockSpec((D, OC), lambda b_: (0, 0)),
            pl.BlockSpec((1, OC), lambda b_: (0, 0)),
        ],
        out_specs=pl.BlockSpec((1, OC, N), lambda b_: (b_, 0, 0)),
        compiler_params=pltpu.CompilerParams(dimension_semantics=("parallel",)),
    )(tokens, w, b)


# ----------------------------------------------------------------------------
# Parameter init (deterministic, synthetic — no checkpoint loading)
# Weights stored bf16 (MXU operands); LN params / biases stay f32.
# ----------------------------------------------------------------------------
def init_params(key, *, in_chans=3, patch=2, dim=256, depth=2, num_heads=2,
                mlp_ratio=4, out_chans=256, k_pad=128):
    assert dim % num_heads == 0
    hd = dim // num_heads
    hidden = dim * mlp_ratio
    scale = 1.0 / math.sqrt(hd)
    std = 0.02
    keys = iter(jax.random.split(key, 2 + 4 * depth))

    def nrm_f32(shape):
        return std * jax.random.normal(next(keys), shape, jnp.float32)

    kin = in_chans * patch * patch
    kp = max(k_pad, _round_up(kin, 8))
    # patch-embed conv (k=stride=patch) as a matmul, K zero-padded to lane width
    w_patch = jnp.zeros((kp, dim), jnp.float32).at[:kin].set(nrm_f32((kin, dim)))

    params = {
        "patch": patch, "dim": dim, "depth": depth, "out_chans": out_chans,
        "num_heads": num_heads, "k_pad": kp,
        "w_patch": w_patch.astype(jnp.bfloat16),
        "b_patch": jnp.zeros((1, dim), jnp.float32),
        # neck 1x1 conv as a matmul: [D, out_chans]  (out_chans lane-dense)
        "w_neck": nrm_f32((dim, out_chans)).astype(jnp.bfloat16),
        "b_neck": jnp.zeros((1, out_chans), jnp.float32),
        "blocks": [],
    }
    for _ in range(depth):
        # fused QKV weight; 1/sqrt(hd) folded into the q columns at init time
        w_qkv = nrm_f32((dim, 3 * dim))
        w_qkv = w_qkv.at[:, :dim].multiply(scale)
        b_qkv = jnp.zeros((1, 3 * dim), jnp.float32)   # q-part scaling is a no-op on zeros
        params["blocks"].append({
            "ln1_g": jnp.ones((1, dim), jnp.float32),
            "ln1_b": jnp.zeros((1, dim), jnp.float32),
            "w_qkv": w_qkv.astype(jnp.bfloat16),
            "b_qkv": b_qkv,
            "w_proj": nrm_f32((dim, dim)).astype(jnp.bfloat16),   # merged heads
            "b_proj": jnp.zeros((1, dim), jnp.float32),
            "ln2_g": jnp.ones((1, dim), jnp.float32),
            "ln2_b": jnp.zeros((1, dim), jnp.float32),
            "w1": nrm_f32((dim, hidden)).astype(jnp.bfloat16),
            "b1": jnp.zeros((1, hidden), jnp.float32),
            "w2": nrm_f32((hidden, dim)).astype(jnp.bfloat16),
            "b2": jnp.zeros((1, dim), jnp.float32),
        })
    return params


# ----------------------------------------------------------------------------
# SAM_o forward: image -> (image_embedding, mul_outputs)
# ----------------------------------------------------------------------------
def sam_o_forward(params, image):
    # image: NCHW [B, C, H, W]
    B, C, H, W = image.shape
    p = params["patch"]
    D = params["dim"]
    OC = params["out_chans"]
    Hp, Wp = H // p, W // p
    N = Hp * Wp

    # --- glue: unfold image into patches (== conv k=stride=patch) ---
    # TODO(synk): fold this unfold into the patch-embed pallas_call via an
    # (Hp, Wp) BlockSpec index_map to also remove this XLA transpose.
    x = image.reshape(B, C, Hp, p, Wp, p)
    x = jnp.transpose(x, (0, 2, 4, 1, 3, 5)).reshape(B * N, C * p * p)
    kin = C * p * p
    kp = params["w_patch"].shape[0]
    if kp != kin:                                   # zero-pad K to lane width
        x = jnp.pad(x, ((0, 0), (0, kp - kin)))

    # --- Pallas: patch embedding matmul (bf16 MXU, bf16 residual stream out) ---
    tokens = matmul_bias(x.astype(jnp.bfloat16), params["w_patch"],
                         params["b_patch"], out_dtype=jnp.bfloat16)
    tokens = tokens.reshape(B, N, D)

    # --- Pallas: transformer blocks, collecting multi-scale outputs ---
    mul_outputs = []
    for blk in params["blocks"]:
        tokens = vit_block(tokens, blk, params["num_heads"])
        mul_outputs.append(tokens.reshape(B, Hp, Wp, D))

    # --- Pallas: neck (1x1 conv == linear), channels-first emitted in-kernel ---
    # TODO(synk): real SAM neck also has LayerNorm2d + 3x3 conv; kept as a
    # lane-dense 1x1 projection here.
    emb = neck(tokens, params["w_neck"], params["b_neck"])   # [B, OC, N]
    image_embedding = emb.reshape(B, OC, Hp, Wp)             # free reshape, NCHW

    return image_embedding, mul_outputs


if __name__ == "__main__":
    key = jax.random.PRNGKey(0)
    B, C, H, W = 2, 3, 32, 32
    image = jax.random.normal(key, (B, C, H, W), jnp.float32)

    params = init_params(jax.random.PRNGKey(1), in_chans=C, patch=2, dim=256,
                         depth=2, num_heads=2, mlp_ratio=4, out_chans=256)

    image_embedding, mul_outputs = sam_o_forward(params, image)
    jax.block_until_ready(image_embedding)
    for m in mul_outputs:
        jax.block_until_ready(m)

    assert image_embedding.shape == (B, 256, 16, 16), image_embedding.shape
    assert len(mul_outputs) == 2 and mul_outputs[0].shape == (B, 16, 16, 256)
    assert bool(jnp.all(jnp.isfinite(image_embedding)))
    print("KERNEL_OK")
</pallas_src>

<mosaic_0001>
module attributes {stable_mosaic.version = 11 : i64} {
  func.func @_matmul_bias_kernel(%arg0: i32, %arg1: memref<512x128xbf16, #tpu.memory_space<vmem>>, %arg2: memref<128x256xbf16, #tpu.memory_space<vmem>>, %arg3: memref<1x256xf32, #tpu.memory_space<vmem>>, %arg4: memref<512x256xbf16, #tpu.memory_space<vmem>>) attributes {dimension_semantics = [#tpu.dimension_semantics<parallel>], iteration_bounds = array<i64: 1>, scalar_prefetch = 0 : i64, scratch_operands = 0 : i64, tpu.core_type = #tpu.core_type<tc>, window_params = [{transform_indices = @transform_0, window_bounds = array<i64: 512, 128>}, {pipeline_mode = #tpu.pipeline_mode<synchronous>, transform_indices = @transform_1, window_bounds = array<i64: 128, 256>}, {pipeline_mode = #tpu.pipeline_mode<synchronous>, transform_indices = @transform_2, window_bounds = array<i64: 1, 256>}, {transform_indices = @transform_3, window_bounds = array<i64: 512, 256>}]} {
    %c0 = arith.constant 0 : index
    %c0_0 = arith.constant 0 : index
    %0 = vector.load %arg1[%c0, %c0_0] : memref<512x128xbf16, #tpu.memory_space<vmem>>, vector<512x128xbf16>
    %c0_1 = arith.constant 0 : index
    %c0_2 = arith.constant 0 : index
    %1 = vector.load %arg2[%c0_1, %c0_2] : memref<128x256xbf16, #tpu.memory_space<vmem>>, vector<128x256xbf16>
    %cst = arith.constant dense<0.000000e+00> : vector<512x256xf32>
    %2 = tpu.matmul %0, %1, %cst {dimension_numbers = #tpu.dot_dimension_numbers<[1], [0], [0], [1], [0, 0, 1, 1], [], []>} : vector<512x128xbf16>, vector<128x256xbf16>, vector<512x256xf32> -> vector<512x256xf32>
    %c0_3 = arith.constant 0 : index
    %c0_4 = arith.constant 0 : index
    %3 = vector.load %arg3[%c0_3, %c0_4] : memref<1x256xf32, #tpu.memory_space<vmem>>, vector<1x256xf32>
    %4 = vector.broadcast %3 : vector<1x256xf32> to vector<512x256xf32>
    %5 = arith.addf %2, %4 : vector<512x256xf32>
    %6 = arith.truncf %5 : vector<512x256xf32> to vector<512x256xbf16>
    %c0_5 = arith.constant 0 : index
    %c0_6 = arith.constant 0 : index
    %7 = vector.load %arg4[%c0_5, %c0_6] : memref<512x256xbf16, #tpu.memory_space<vmem>>, vector<512x256xbf16>
    tpu.vector_store %arg4[%c0_5, %c0_6], %6 {strides = array<i32>} : memref<512x256xbf16, #tpu.memory_space<vmem>>, vector<512x256xbf16>,
    return
  }
  func.func @transform_0(%arg0: i32) -> (i32, i32) {
    %c0_i32 = arith.constant 0 : i32
    %c0_i32_0 = arith.constant 0 : i32
    return %arg0, %c0_i32 : i32, i32
  }
  func.func @transform_1(%arg0: i32) -> (i32, i32) {
    %c0_i32 = arith.constant 0 : i32
    %c0_i32_0 = arith.constant 0 : i32
    %c0_i32_1 = arith.constant 0 : i32
    return %c0_i32, %c0_i32_0 : i32, i32
  }
  func.func @transform_2(%arg0: i32) -> (i32, i32) {
    %c0_i32 = arith.constant 0 : i32
    %c0_i32_0 = arith.constant 0 : i32
    %c0_i32_1 = arith.constant 0 : i32
    return %c0_i32, %c0_i32_0 : i32, i32
  }
  func.func @transform_3(%arg0: i32) -> (i32, i32) {
    %c0_i32 = arith.constant 0 : i32
    %c0_i32_0 = arith.constant 0 : i32
    return %arg0, %c0_i32 : i32, i32
  }
}

</mosaic_0001>

<bundles_post_ra>
// kernel: tpu_custom_call.1
= control target key start
LH: loop header
LB: loop body
LE: loop exit
PB: predicated region body
PF: predicated region fallthrough
CT: control target
= control target key end

     0   :  { %8 = vsyncpa [#allocation3], 0  ;;  %s1759_s0 = inlined_call_operand.hbm [shape: bf16[512,128], index: 0, kind: input, shape index: {}]   ;;  %s1760_s1 = inlined_call_operand.hbm [shape: bf16[128,256], index: 1, kind: input, shape index: {}]   ;;  %s1761_s2 = inlined_call_operand.vmem [shape: f32[1,256], index: 2, kind: input, shape index: {}]   ;;  %s1762_s3 = inlined_call_operand.hbm [shape: bf16[512,256], index: 3, kind: output, shape index: {}]  }
   0x1   :  { %9 = vsyncpa [#allocation6], 0 }
   0x2   :  { %10 = vsyncpa [#allocation4], 0  ;;  %s1549_s12 = smov [#allocation2]  }
   0x3   :  { %s16_s13 = sshll.u32 %s1549_s12, 4  ;;  %s17_s13 = int_to_ptr.vmem [resolvable:$true] %s16_s13 }
   0x4   :  { %s1491_s14 = scalar_lea.vmem %s17_s13, 4096  ;;  %p1496_p1 = scmp.lt.s32.totalorder %s17_s13, %s17_s13 }
   0x5   :  { %p1492_p0 = scmp.ne.s32.totalorder %s17_s13, %s1491_s14  ;;  %p1497_p2 = scmp.lt.s32.totalorder %s1491_s14, %s1491_s14 }
   0x7   :  { %p1498_p3 = por %p1497_p2, %p1496_p1 }
   0x9   :  { %p1499_p4 = pnand %p1498_p3, %p1492_p0 }
   0xb   :  { %1502 = shalt.err (!%p1499_p4)
}
   0xc   :  { %s1550_s15 = smov 64   ;;  %s1551_s16 = smov 4  }
   0xd   :  { %22 = dma.hbm_to_vmem [thread:$0]  %s1759_s0, 4096, %s17_s13, [#allocation3], %s1550_s15, %s1550_s15, %s1551_s16  }
   0xe   :  { %s1552_s19 = smov [#allocation5]  }
   0xf   :  { %s28_s20 = sshll.u32 %s1552_s19, 4  ;;  %s29_s20 = int_to_ptr.vmem [resolvable:$true] %s28_s20 }
  0x10   :  { %s1511_s21 = scalar_lea.vmem %s29_s20, 2048  ;;  %p1516_p6 = scmp.lt.s32.totalorder %s29_s20, %s29_s20 }
  0x11   :  { %p1512_p5 = scmp.ne.s32.totalorder %s29_s20, %s1511_s21  ;;  %p1517_p7 = scmp.lt.s32.totalorder %s1511_s21, %s1511_s21 }
  0x13   :  { %p1518_p8 = por %p1517_p7, %p1516_p6 }
  0x15   :  { %p1519_p9 = pnand %p1518_p8, %p1512_p5 }
  0x17   :  { %1522 = shalt.err (!%p1519_p9)
}
  0x18   :  { %s1553_s22 = smov 128   ;;  %s1554_s23 = smov 8  }
  0x19   :  { %34 = dma.hbm_to_vmem [thread:$0]  %s1760_s1, 2048, %s29_s20, [#allocation6], %s1553_s22, %s1553_s22, %s1554_s23  }
  0x1a   :  { %1543 = dma.done.wait [#allocation3], 4096  }
  0x1b   :  { %1544 = vsyncadd [#allocation3], 4294963200 }
  0x1c   :  { %1545 = dma.done.wait [#allocation6], 2048  }
  0x1d   :  { %1546 = vsyncadd [#allocation6], 4294965248  ;;  %v1555_v0 = vmov 0   ;;  %v1427_v1 = vld [vmem:[#allocation5 + $0x74] ss:$8 sps:$4 sm:$0xff]   ;;  %v1451_v17 = vld [vmem:[#allocation2] sm:$0xff]   ;;  %v126_v49 = vlaneseq }
  0x1e   :  { %440 = vmatprep.mubr.bf16.mxu0 %v1555_v0  ;;  %600 = vmatprep.mubr.bf16.mxu1 %v1555_v0  ;;  %v1429_v2 = vld [vmem:[#allocation5 + $0x70] ss:$8 sps:$4 sm:$0xff]   ;;  %v1430_v3 = vld [vmem:[#allocation5 + $0x64] ss:$8 sps:$4 sm:$0xff]   ;;  %v1432_v4 = vld [vmem:[#allocation5 + $0x60] ss:$8 sps:$4 sm:$0xff]  }
  0x1f   :  { %408 = vmatprep.subr.bf16.mxu0 %v1427_v1  ;;  %1403 = vmatprep.subr.bf16.mxu1 %v1427_v1  ;;  %v1433_v5 = vld [vmem:[#allocation5 + $0x54] ss:$8 sps:$4 sm:$0xff]   ;;  %v1435_v6 = vld [vmem:[#allocation5 + $0x50] ss:$8 sps:$4 sm:$0xff]   ;;  %v1436_v7 = vld [vmem:[#allocation5 + $0x44] ss:$8 sps:$4 sm:$0xff]  }
  0x20   :  { %409 = vmatpush1.bf16.msra.mxu0 %v1429_v2  ;;  %1411 = vmatpush1.bf16.msra.mxu1 %v1429_v2  ;;  %v1438_v8 = vld [vmem:[#allocation5 + $0x40] ss:$8 sps:$4 sm:$0xff]   ;;  %v1439_v9 = vld [vmem:[#allocation5 + $0x34] ss:$8 sps:$4 sm:$0xff]   ;;  %v1441_v10 = vld [vmem:[#allocation5 + $0x30] ss:$8 sps:$4 sm:$0xff]  }
  0x21   :  { %410 = vmatprep.subr.bf16.mxu0 %v1430_v3  ;;  %1404 = vmatprep.subr.bf16.mxu1 %v1430_v3  ;;  %v1442_v11 = vld [vmem:[#allocation5 + $0x24] ss:$8 sps:$4 sm:$0xff]   ;;  %v1444_v12 = vld [vmem:[#allocation5 + $0x20] ss:$8 sps:$4 sm:$0xff]   ;;  %v1445_v13 = vld [vmem:[#allocation5 + $0x14] ss:$8 sps:$4 sm:$0xff]  }
  0x22   :  { %v1447_v14 = vld [vmem:[#allocation5 + $0x10] ss:$8 sps:$4 sm:$0xff]   ;;  %v1448_v15 = vld [vmem:[#allocation5 + $0x4] ss:$8 sps:$4 sm:$0xff]   ;;  %v1450_v16 = vld [vmem:[#allocation5] ss:$8 sps:$4 sm:$0xff]  }
  0x23   :  { %v1452_v18 = vld [vmem:[#allocation2 + $0x80] sm:$0xff]   ;;  %v1453_v19 = vld [vmem:[#allocation2 + $0x8] sm:$0xff]   ;;  %v1455_v21 = vld [vmem:[#allocation2 + $0x10] sm:$0xff]   ;;  %v127_v50 = vshrl.u32 %v126_v49, 7 }
  0x24   :  { %411 = vmatpush1.bf16.msra.mxu0 %v1432_v4  ;;  %1412 = vmatpush1.bf16.msra.mxu1 %v1432_v4  ;;  %v1454_v20 = vld [vmem:[#allocation2 + $0x88] sm:$0xff]   ;;  %v1456_v22 = vld [vmem:[#allocation2 + $0x90] sm:$0xff]   ;;  %v1457_v23 = vld [vmem:[#allocation2 + $0x18] sm:$0xff]  }
  0x25   :  { %412 = vmatprep.subr.bf16.mxu0 %v1433_v5  ;;  %1405 = vmatprep.subr.bf16.mxu1 %v1433_v5  ;;  %v1458_v24 = vld [vmem:[#allocation2 + $0x98] sm:$0xff]   ;;  %v1459_v25 = vld [vmem:[#allocation2 + $0x20] sm:$0xff]   ;;  %v1461_v27 = vld [vmem:[#allocation2 + $0x28] sm:$0xff]   ;;  %v128_v51 = vsub.s32 0, %v127_v50  ;;  %v132_v52 = vsub.s32 1, %v127_v50 }
  0x26   :  { %v1460_v26 = vld [vmem:[#allocation2 + $0xa0] sm:$0xff]   ;;  %v1462_v28 = vld [vmem:[#allocation2 + $0xa8] sm:$0xff]   ;;  %v1463_v29 = vld [vmem:[#allocation2 + $0x30] sm:$0xff]  }
  0x27   :  { %v1464_v30 = vld [vmem:[#allocation2 + $0xb0] sm:$0xff]   ;;  %v1465_v31 = vld [vmem:[#allocation2 + $0x38] sm:$0xff]   ;;  %v1467_v33 = vld [vmem:[#allocation2 + $0x40] sm:$0xff]  }
  0x28   :  { %413 = vmatpush1.bf16.msra.mxu0 %v1435_v6  ;;  %1413 = vmatpush1.bf16.msra.mxu1 %v1435_v6  ;;  %v1466_v32 = vld [vmem:[#allocation2 + $0xb8] sm:$0xff]   ;;  %v1468_v34 = vld [vmem:[#allocation2 + $0xc0] sm:$0xff]   ;;  %v1469_v35 = vld [vmem:[#allocation2 + $0x48] sm:$0xff]  }
  0x29   :  { %414 = vmatprep.subr.bf16.mxu0 %v1436_v7  ;;  %1406 = vmatprep.subr.bf16.mxu1 %v1436_v7  ;;  %v1470_v36 = vld [vmem:[#allocation2 + $0xc8] sm:$0xff]   ;;  %v1471_v37 = vld [vmem:[#allocation2 + $0x50] sm:$0xff]   ;;  %v1473_v39 = vld [vmem:[#allocation2 + $0x58] sm:$0xff]  }
  0x2a   :  { %v1472_v38 = vld [vmem:[#allocation2 + $0xd0] sm:$0xff]   ;;  %v1474_v40 = vld [vmem:[#allocation2 + $0xd8] sm:$0xff]   ;;  %v1475_v41 = vld [vmem:[#allocation2 + $0x60] sm:$0xff]  }
  0x2b   :  { %v1476_v42 = vld [vmem:[#allocation2 + $0xe0] sm:$0xff]   ;;  %v1477_v43 = vld [vmem:[#allocation2 + $0x68] sm:$0xff]   ;;  %v1479_v45 = vld [vmem:[#allocation2 + $0x70] sm:$0xff]  }
  0x2c   :  { %415 = vmatpush1.bf16.msra.mxu0 %v1438_v8  ;;  %1414 = vmatpush1.bf16.msra.mxu1 %v1438_v8  ;;  %v1478_v44 = vld [vmem:[#allocation2 + $0xe8] sm:$0xff]   ;;  %v1480_v46 = vld [vmem:[#allocation2 + $0xf0] sm:$0xff]   ;;  %v1481_v47 = vld [vmem:[#allocation2 + $0x78] sm:$0xff]  }
  0x2d   :  { %416 = vmatprep.subr.bf16.mxu0 %v1439_v9  ;;  %1407 = vmatprep.subr.bf16.mxu1 %v1439_v9  ;;  %v1482_v48 = vld [vmem:[#allocation2 + $0xf8] sm:$0xff]   ;;  %v124_v53 = vld [vmem:[%s1761_s2] sm:$0x3]  ;;  %s1556_s2 = smov [#allocation7]  }
  0x2e   :  { %v1621_v54 = vrot.slane %v124_v53, %v128_v51  ;;  %v1623_v55 = vrot.slane %v124_v53, %v132_v52  ;;  %s1214_s26 = sshll.u32 %s1556_s2, 4  ;;  %s1215_s26 = int_to_ptr.vmem [resolvable:$true] %s1214_s26 }
  0x2f   :  { %s1523_s27 = scalar_lea.vmem %s1215_s26, 8192  ;;  %p1528_p11 = scmp.lt.s32.totalorder %s1215_s26, %s1215_s26 }
  0x30   :  { %417 = vmatpush1.bf16.msra.mxu0 %v1441_v10  ;;  %1415 = vmatpush1.bf16.msra.mxu1 %v1441_v10  ;;  %p1524_p10 = scmp.ne.s32.totalorder %s1215_s26, %s1523_s27  ;;  %p1529_p12 = scmp.lt.s32.totalorder %s1523_s27, %s1523_s27 }
  0x31   :  { %418 = vmatprep.subr.bf16.mxu0 %v1442_v11  ;;  %1408 = vmatprep.subr.bf16.mxu1 %v1442_v11 }
  0x32   :  { %p1530_p13 = por %p1529_p12, %p1528_p11 }
  0x34   :  { %419 = vmatpush1.bf16.msra.mxu0 %v1444_v12  ;;  %1416 = vmatpush1.bf16.msra.mxu1 %v1444_v12  ;;  %p1531_p0 = pnand %p1530_p13, %p1524_p10 }
  0x35   :  { %420 = vmatprep.subr.bf16.mxu0 %v1445_v13  ;;  %1409 = vmatprep.subr.bf16.mxu1 %v1445_v13 }
  0x38   :  { %421 = vmatpush1.bf16.msra.mxu0 %v1447_v14  ;;  %1417 = vmatpush1.bf16.msra.mxu1 %v1447_v14 }
  0x39   :  { %422 = vmatprep.subr.bf16.mxu0 %v1448_v15  ;;  %1410 = vmatprep.subr.bf16.mxu1 %v1448_v15 }
  0x3c   :  { %423 = vmatpush1.bf16.msra.mxu0 %v1450_v16  ;;  %1418 = vmatpush1.bf16.msra.mxu1 %v1450_v16 }
  0x3f   :  { %441 = vmatmul.mubr.bf16.vlgmr.msra.gmra.mxu0 %v1451_v17  ;;  %601 = vmatmul.mubr.bf16.vlgmr.msra.gmra.mxu1 %v1452_v18 }
  0x40   :  { %450 = vmatprep.mubr.bf16.mxu0 %v1555_v0  ;;  %610 = vmatprep.mubr.bf16.mxu1 %v1555_v0 }
  0x47   :  { %451 = vmatmul.mubr.bf16.gmra.mxu0 %v1453_v19  ;;  %611 = vmatmul.mubr.bf16.gmra.mxu1 %v1454_v20 }
  0x48   :  { %460 = vmatprep.mubr.bf16.mxu0 %v1555_v0  ;;  %620 = vmatprep.mubr.bf16.mxu1 %v1555_v0 }
  0x4f   :  { %461 = vmatmul.mubr.bf16.gmra.mxu0 %v1455_v21  ;;  %621 = vmatmul.mubr.bf16.gmra.mxu1 %v1456_v22 }
  0x50   :  { %470 = vmatprep.mubr.bf16.mxu0 %v1555_v0  ;;  %630 = vmatprep.mubr.bf16.mxu1 %v1555_v0 }
  0x57   :  { %471 = vmatmul.mubr.bf16.gmra.mxu0 %v1457_v23  ;;  %631 = vmatmul.mubr.bf16.gmra.mxu1 %v1458_v24 }
  0x58   :  { %480 = vmatprep.mubr.bf16.mxu0 %v1555_v0  ;;  %640 = vmatprep.mubr.bf16.mxu1 %v1555_v0 }
  0x5f   :  { %481 = vmatmul.mubr.bf16.gmra.mxu0 %v1459_v25  ;;  %641 = vmatmul.mubr.bf16.gmra.mxu1 %v1460_v26 }
  0x60   :  { %490 = vmatprep.mubr.bf16.mxu0 %v1555_v0  ;;  %650 = vmatprep.mubr.bf16.mxu1 %v1555_v0 }
  0x67   :  { %491 = vmatmul.mubr.bf16.gmra.mxu0 %v1461_v27  ;;  %651 = vmatmul.mubr.bf16.gmra.mxu1 %v1462_v28 }
  0x68   :  { %500 = vmatprep.mubr.bf16.mxu0 %v1555_v0  ;;  %660 = vmatprep.mubr.bf16.mxu1 %v1555_v0 }
  0x6f   :  { %501 = vmatmul.mubr.bf16.gmra.mxu0 %v1463_v29  ;;  %661 = vmatmul.mubr.bf16.gmra.mxu1 %v1464_v30 }
  0x70   :  { %510 = vmatprep.mubr.bf16.mxu0 %v1555_v0  ;;  %670 = vmatprep.mubr.bf16.mxu1 %v1555_v0 }
  0x77   :  { %511 = vmatmul.mubr.bf16.gmra.mxu0 %v1465_v31  ;;  %671 = vmatmul.mubr.bf16.gmra.mxu1 %v1466_v32 }
  0x78   :  { %520 = vmatprep.mubr.bf16.mxu0 %v1555_v0  ;;  %680 = vmatprep.mubr.bf16.mxu1 %v1555_v0 }
  0x7f   :  { %521 = vmatmul.mubr.bf16.gmra.mxu0 %v1467_v33  ;;  %681 = vmatmul.mubr.bf16.gmra.mxu1 %v1468_v34 }
  0x80   :  { %530 = vmatprep.mubr.bf16.mxu0 %v1555_v0  ;;  %690 = vmatprep.mubr.bf16.mxu1 %v1555_v0 }
  0x87   :  { %531 = vmatmul.mubr.bf16.gmra.mxu0 %v1469_v35  ;;  %691 = vmatmul.mubr.bf16.gmra.mxu1 %v1470_v36 }
  0x88   :  { %540 = vmatprep.mubr.bf16.mxu0 %v1555_v0  ;;  %700 = vmatprep.mubr.bf16.mxu1 %v1555_v0 }
  0x8f   :  { %541 = vmatmul.mubr.bf16.gmra.mxu0 %v1471_v37  ;;  %701 = vmatmul.mubr.bf16.gmra.mxu1 %v1472_v38 }
  0x90   :  { %550 = vmatprep.mubr.bf16.mxu0 %v1555_v0  ;;  %710 = vmatprep.mubr.bf16.mxu1 %v1555_v0 }
  0x97   :  { %551 = vmatmul.mubr.bf16.gmra.mxu0 %v1473_v39  ;;  %711 = vmatmul.mubr.bf16.gmra.mxu1 %v1474_v40 }
  0x98   :  { %560 = vmatprep.mubr.bf16.mxu0 %v1555_v0  ;;  %720 = vmatprep.mubr.bf16.mxu1 %v1555_v0 }
  0x9f   :  { %561 = vmatmul.mubr.bf16.gmra.mxu0 %v1475_v41  ;;  %721 = vmatmul.mubr.bf16.gmra.mxu1 %v1476_v42 }
  0xa0   :  { %570 = vmatprep.mubr.bf16.mxu0 %v1555_v0  ;;  %730 = vmatprep.mubr.bf16.mxu1 %v1555_v0 }
  0xa7   :  { %571 = vmatmul.mubr.bf16.gmra.mxu0 %v1477_v43  ;;  %731 = vmatmul.mubr.bf16.gmra.mxu1 %v1478_v44 }
  0xa8   :  { %580 = vmatprep.mubr.bf16.mxu0 %v1555_v0  ;;  %740 = vmatprep.mubr.bf16.mxu1 %v1555_v0 }
  0xaf   :  { %581 = vmatmul.mubr.bf16.gmra.mxu0 %v1479_v45  ;;  %741 = vmatmul.mubr.bf16.gmra.mxu1 %v1480_v46 }
  0xb0   :  { %590 = vmatprep.mubr.bf16.mxu0 %v1555_v0  ;;  %750 = vmatprep.mubr.bf16.mxu1 %v1555_v0 }
  0xb7   :  { %591 = vmatmul.mubr.bf16.gmra.mxu0 %v1481_v47  ;;  %751 = vmatmul.mubr.bf16.gmra.mxu1 %v1482_v48 }
  0xff   :  { %v442_v56 = vpop.f32.mrf.mxu0  ;;  %v602_v57 = vpop.f32.mrf.mxu1 }
 0x100   :  { %v443_v60 = vadd.f32 %v442_v56, %v1621_v54  ;;  %v603_v61 = vadd.f32 %v602_v57, %v1621_v54 }
 0x101   :  { %v444_v58 = vpop.f32.mrf.mxu0  ;;  %v604_v59 = vpop.f32.mrf.mxu1 }
 0x102   :  { %v445_v62 = vadd.f32 %v444_v58, %v1623_v55  ;;  %v605_v63 = vadd.f32 %v604_v59, %v1623_v55 }
 0x103   :  { %v446_v0 = vpop.f32.mrf.mxu0  ;;  %v606_v1 = vpop.f32.mrf.mxu1 }
 0x104   :  { %v1339_v2 = vpack.c.bf16 %v445_v62, %v443_v60  ;;  %v1371_v3 = vpack.c.bf16 %v605_v63, %v603_v61  ;;  %v447_v6 = vadd.f32 %v446_v0, %v1621_v54  ;;  %v607_v7 = vadd.f32 %v606_v1, %v1621_v54 }
 0x105   :  { %v448_v4 = vpop.f32.mrf.mxu0  ;;  %v608_v5 = vpop.f32.mrf.mxu1 }
 0x106   :  { %1145 = vst [vmem:[#allocation7] sm:$0xff] %v1339_v2  ;;  %1177 = vst [vmem:[#allocation7 + $0x100] sm:$0xff] %v1371_v3  ;;  %v449_v8 = vadd.f32 %v448_v4, %v1623_v55  ;;  %v609_v9 = vadd.f32 %v608_v5, %v1623_v55 }
 0x107   :  { %v452_v10 = vpop.f32.mrf.mxu0  ;;  %v612_v11 = vpop.f32.mrf.mxu1 }
 0x108   :  { %v1340_v12 = vpack.c.bf16 %v449_v8, %v447_v6  ;;  %v1372_v13 = vpack.c.bf16 %v609_v9, %v607_v7  ;;  %v453_v16 = vadd.f32 %v452_v10, %v1621_v54  ;;  %v613_v17 = vadd.f32 %v612_v11, %v1621_v54 }
 0x109   :  { %v454_v14 = vpop.f32.mrf.mxu0  ;;  %v614_v15 = vpop.f32.mrf.mxu1 }
 0x10a   :  { %1146 = vst [vmem:[#allocation7 + $0x8] sm:$0xff] %v1340_v12  ;;  %1178 = vst [vmem:[#allocation7 + $0x108] sm:$0xff] %v1372_v13  ;;  %v455_v18 = vadd.f32 %v454_v14, %v1623_v55  ;;  %v615_v19 = vadd.f32 %v614_v15, %v1623_v55 }
 0x10b   :  { %v456_v20 = vpop.f32.mrf.mxu0  ;;  %v616_v21 = vpop.f32.mrf.mxu1 }
 0x10c   :  { %v1341_v22 = vpack.c.bf16 %v455_v18, %v453_v16  ;;  %v1373_v23 = vpack.c.bf16 %v615_v19, %v613_v17  ;;  %v457_v26 = vadd.f32 %v456_v20, %v1621_v54  ;;  %v617_v27 = vadd.f32 %v616_v21, %v1621_v54 }
 0x10d   :  { %v458_v24 = vpop.f32.mrf.mxu0  ;;  %v618_v25 = vpop.f32.mrf.mxu1 }
 0x10e   :  { %1147 = vst [vmem:[#allocation7 + $0x10] sm:$0xff] %v1341_v22  ;;  %1179 = vst [vmem:[#allocation7 + $0x110] sm:$0xff] %v1373_v23  ;;  %v459_v28 = vadd.f32 %v458_v24, %v1623_v55  ;;  %v619_v29 = vadd.f32 %v618_v25, %v1623_v55 }
 0x10f   :  { %v462_v30 = vpop.f32.mrf.mxu0  ;;  %v622_v31 = vpop.f32.mrf.mxu1 }
 0x110   :  { %v1342_v32 = vpack.c.bf16 %v459_v28, %v457_v26  ;;  %v1374_v33 = vpack.c.bf16 %v619_v29, %v617_v27  ;;  %v463_v36 = vadd.f32 %v462_v30, %v1621_v54  ;;  %v623_v37 = vadd.f32 %v622_v31, %v1621_v54 }
 0x111   :  { %v464_v34 = vpop.f32.mrf.mxu0  ;;  %v624_v35 = vpop.f32.mrf.mxu1 }
 0x112   :  { %1148 = vst [vmem:[#allocation7 + $0x18] sm:$0xff] %v1342_v32  ;;  %1180 = vst [vmem:[#allocation7 + $0x118] sm:$0xff] %v1374_v33  ;;  %v465_v38 = vadd.f32 %v464_v34, %v1623_v55  ;;  %v625_v39 = vadd.f32 %v624_v35, %v1623_v55 }
 0x113   :  { %v466_v40 = vpop.f32.mrf.mxu0  ;;  %v626_v41 = vpop.f32.mrf.mxu1 }
 0x114   :  { %v1343_v42 = vpack.c.bf16 %v465_v38, %v463_v36  ;;  %v1375_v43 = vpack.c.bf16 %v625_v39, %v623_v37  ;;  %v467_v46 = vadd.f32 %v466_v40, %v1621_v54  ;;  %v627_v47 = vadd.f32 %v626_v41, %v1621_v54 }
 0x115   :  { %v468_v44 = vpop.f32.mrf.mxu0  ;;  %v628_v45 = vpop.f32.mrf.mxu1 }
 0x116   :  { %1149 = vst [vmem:[#allocation7 + $0x20] sm:$0xff] %v1343_v42  ;;  %1181 = vst [vmem:[#allocation7 + $0x120] sm:$0xff] %v1375_v43  ;;  %v469_v48 = vadd.f32 %v468_v44, %v1623_v55  ;;  %v629_v49 = vadd.f32 %v628_v45, %v1623_v55 }
 0x117   :  { %v472_v50 = vpop.f32.mrf.mxu0  ;;  %v632_v51 = vpop.f32.mrf.mxu1 }
 0x118   :  { %v1344_v52 = vpack.c.bf16 %v469_v48, %v467_v46  ;;  %v1376_v53 = vpack.c.bf16 %v629_v49, %v627_v47  ;;  %v473_v58 = vadd.f32 %v472_v50, %v1621_v54  ;;  %v633_v59 = vadd.f32 %v632_v51, %v1621_v54 }
 0x119   :  { %v474_v56 = vpop.f32.mrf.mxu0  ;;  %v634_v57 = vpop.f32.mrf.mxu1 }
 0x11a   :  { %1150 = vst [vmem:[#allocation7 + $0x28] sm:$0xff] %v1344_v52  ;;  %1182 = vst [vmem:[#allocation7 + $0x128] sm:$0xff] %v1376_v53  ;;  %v475_v60 = vadd.f32 %v474_v56, %v1623_v55  ;;  %v635_v61 = vadd.f32 %v634_v57, %v1623_v55 }
 0x11b   :  { %v476_v62 = vpop.f32.mrf.mxu0  ;;  %v636_v63 = vpop.f32.mrf.mxu1 }
 0x11c   :  { %v1345_v0 = vpack.c.bf16 %v475_v60, %v473_v58  ;;  %v1377_v1 = vpack.c.bf16 %v635_v61, %v633_v59  ;;  %v477_v4 = vadd.f32 %v476_v62, %v1621_v54  ;;  %v637_v5 = vadd.f32 %v636_v63, %v1621_v54 }
 0x11d   :  { %v478_v2 = vpop.f32.mrf.mxu0  ;;  %v638_v3 = vpop.f32.mrf.mxu1 }
 0x11e   :  { %1151 = vst [vmem:[#allocation7 + $0x30] sm:$0xff] %v1345_v0  ;;  %1183 = vst [vmem:[#allocation7 + $0x130] sm:$0xff] %v1377_v1  ;;  %v479_v6 = vadd.f32 %v478_v2, %v1623_v55  ;;  %v639_v7 = vadd.f32 %v638_v3, %v1623_v55 }
 0x11f   :  { %v482_v8 = vpop.f32.mrf.mxu0  ;;  %v642_v9 = vpop.f32.mrf.mxu1 }
 0x120   :  { %v1346_v10 = vpack.c.bf16 %v479_v6, %v477_v4  ;;  %v1378_v11 = vpack.c.bf16 %v639_v7, %v637_v5  ;;  %v483_v14 = vadd.f32 %v482_v8, %v1621_v54  ;;  %v643_v15 = vadd.f32 %v642_v9, %v1621_v54 }
 0x121   :  { %v484_v12 = vpop.f32.mrf.mxu0  ;;  %v644_v13 = vpop.f32.mrf.mxu1 }
 0x122   :  { %1152 = vst [vmem:[#allocation7 + $0x38] sm:$0xff] %v1346_v10  ;;  %1184 = vst [vmem:[#allocation7 + $0x138] sm:$0xff] %v1378_v11  ;;  %v485_v16 = vadd.f32 %v484_v12, %v1623_v55  ;;  %v645_v17 = vadd.f32 %v644_v13, %v1623_v55 }
 0x123   :  { %v486_v18 = vpop.f32.mrf.mxu0  ;;  %v646_v19 = vpop.f32.mrf.mxu1 }
 0x124   :  { %v1347_v20 = vpack.c.bf16 %v485_v16, %v483_v14  ;;  %v1379_v21 = vpack.c.bf16 %v645_v17, %v643_v15  ;;  %v487_v24 = vadd.f32 %v486_v18, %v1621_v54  ;;  %v647_v25 = vadd.f32 %v646_v19, %v1621_v54 }
 0x125   :  { %v488_v22 = vpop.f32.mrf.mxu0  ;;  %v648_v23 = vpop.f32.mrf.mxu1 }
 0x126   :  { %1153 = vst [vmem:[#allocation7 + $0x40] sm:$0xff] %v1347_v20  ;;  %1185 = vst [vmem:[#allocation7 + $0x140] sm:$0xff] %v1379_v21  ;;  %v489_v26 = vadd.f32 %v488_v22, %v1623_v55  ;;  %v649_v27 = vadd.f32 %v648_v23, %v1623_v55 }
 0x127   :  { %v492_v28 = vpop.f32.mrf.mxu0  ;;  %v652_v29 = vpop.f32.mrf.mxu1 }
 0x128   :  { %v1348_v30 = vpack.c.bf16 %v489_v26, %v487_v24  ;;  %v1380_v31 = vpack.c.bf16 %v649_v27, %v647_v25  ;;  %v493_v34 = vadd.f32 %v492_v28, %v1621_v54  ;;  %v653_v35 = vadd.f32 %v652_v29, %v1621_v54 }
 0x129   :  { %v494_v32 = vpop.f32.mrf.mxu0  ;;  %v654_v33 = vpop.f32.mrf.mxu1 }
 0x12a   :  { %1154 = vst [vmem:[#allocation7 + $0x48] sm:$0xff] %v1348_v30  ;;  %1186 = vst [vmem:[#allocation7 + $0x148] sm:$0xff] %v1380_v31  ;;  %v495_v36 = vadd.f32 %v494_v32, %v1623_v55  ;;  %v655_v37 = vadd.f32 %v654_v33, %v1623_v55 }
 0x12b   :  { %v496_v38 = vpop.f32.mrf.mxu0  ;;  %v656_v39 = vpop.f32.mrf.mxu1 }
 0x12c   :  { %v1349_v40 = vpack.c.bf16 %v495_v36, %v493_v34  ;;  %v1381_v41 = vpack.c.bf16 %v655_v37, %v653_v35  ;;  %v497_v44 = vadd.f32 %v496_v38, %v1621_v54  ;;  %v657_v45 = vadd.f32 %v656_v39, %v1621_v54 }
 0x12d   :  { %v498_v42 = vpop.f32.mrf.mxu0  ;;  %v658_v43 = vpop.f32.mrf.mxu1 }
 0x12e   :  { %1155 = vst [vmem:[#allocation7 + $0x50] sm:$0xff] %v1349_v40  ;;  %1187 = vst [vmem:[#allocation7 + $0x150] sm:$0xff] %v1381_v41  ;;  %v499_v46 = vadd.f32 %v498_v42, %v1623_v55  ;;  %v659_v47 = vadd.f32 %v658_v43, %v1623_v55 }
 0x12f   :  { %v502_v48 = vpop.f32.mrf.mxu0  ;;  %v662_v49 = vpop.f32.mrf.mxu1 }
 0x130   :  { %v1350_v50 = vpack.c.bf16 %v499_v46, %v497_v44  ;;  %v1382_v51 = vpack.c.bf16 %v659_v47, %v657_v45  ;;  %v503_v56 = vadd.f32 %v502_v48, %v1621_v54  ;;  %v663_v57 = vadd.f32 %v662_v49, %v1621_v54 }
 0x131   :  { %v504_v52 = vpop.f32.mrf.mxu0  ;;  %v664_v53 = vpop.f32.mrf.mxu1 }
 0x132   :  { %1156 = vst [vmem:[#allocation7 + $0x58] sm:$0xff] %v1350_v50  ;;  %1188 = vst [vmem:[#allocation7 + $0x158] sm:$0xff] %v1382_v51  ;;  %v505_v58 = vadd.f32 %v504_v52, %v1623_v55  ;;  %v665_v59 = vadd.f32 %v664_v53, %v1623_v55 }
 0x133   :  { %v506_v60 = vpop.f32.mrf.mxu0  ;;  %v666_v61 = vpop.f32.mrf.mxu1 }
 0x134   :  { %v1351_v62 = vpack.c.bf16 %v505_v58, %v503_v56  ;;  %v1383_v63 = vpack.c.bf16 %v665_v59, %v663_v57  ;;  %v507_v2 = vadd.f32 %v506_v60, %v1621_v54  ;;  %v667_v3 = vadd.f32 %v666_v61, %v1621_v54 }
 0x135   :  { %v508_v0 = vpop.f32.mrf.mxu0  ;;  %v668_v1 = vpop.f32.mrf.mxu1 }
 0x136   :  { %1157 = vst [vmem:[#allocation7 + $0x60] sm:$0xff] %v1351_v62  ;;  %1189 = vst [vmem:[#allocation7 + $0x160] sm:$0xff] %v1383_v63  ;;  %v509_v4 = vadd.f32 %v508_v0, %v1623_v55  ;;  %v669_v5 = vadd.f32 %v668_v1, %v1623_v55 }
 0x137   :  { %v512_v6 = vpop.f32.mrf.mxu0  ;;  %v672_v7 = vpop.f32.mrf.mxu1 }
 0x138   :  { %v1352_v8 = vpack.c.bf16 %v509_v4, %v507_v2  ;;  %v1384_v9 = vpack.c.bf16 %v669_v5, %v667_v3  ;;  %v513_v12 = vadd.f32 %v512_v6, %v1621_v54  ;;  %v673_v13 = vadd.f32 %v672_v7, %v1621_v54 }
 0x139   :  { %v514_v10 = vpop.f32.mrf.mxu0  ;;  %v674_v11 = vpop.f32.mrf.mxu1 }
 0x13a   :  { %1158 = vst [vmem:[#allocation7 + $0x68] sm:$0xff] %v1352_v8  ;;  %1190 = vst [vmem:[#allocation7 + $0x168] sm:$0xff] %v1384_v9  ;;  %v515_v14 = vadd.f32 %v514_v10, %v1623_v55  ;;  %v675_v15 = vadd.f32 %v674_v11, %v1623_v55 }
 0x13b   :  { %v516_v16 = vpop.f32.mrf.mxu0  ;;  %v676_v17 = vpop.f32.mrf.mxu1 }
 0x13c   :  { %v1353_v18 = vpack.c.bf16 %v515_v14, %v513_v12  ;;  %v1385_v19 = vpack.c.bf16 %v675_v15, %v673_v13  ;;  %v517_v22 = vadd.f32 %v516_v16, %v1621_v54  ;;  %v677_v23 = vadd.f32 %v676_v17, %v1621_v54 }
 0x13d   :  { %v518_v20 = vpop.f32.mrf.mxu0  ;;  %v678_v21 = vpop.f32.mrf.mxu1 }
 0x13e   :  { %1159 = vst [vmem:[#allocation7 + $0x70] sm:$0xff] %v1353_v18  ;;  %1191 = vst [vmem:[#allocation7 + $0x170] sm:$0xff] %v1385_v19  ;;  %v519_v24 = vadd.f32 %v518_v20, %v1623_v55  ;;  %v679_v25 = vadd.f32 %v678_v21, %v1623_v55 }
 0x13f   :  { %v522_v26 = vpop.f32.mrf.mxu0  ;;  %v682_v27 = vpop.f32.mrf.mxu1 }
 0x140   :  { %v1354_v28 = vpack.c.bf16 %v519_v24, %v517_v22  ;;  %v1386_v29 = vpack.c.bf16 %v679_v25, %v677_v23  ;;  %v523_v32 = vadd.f32 %v522_v26, %v1621_v54  ;;  %v683_v33 = vadd.f32 %v682_v27, %v1621_v54 }
 0x141   :  { %v524_v30 = vpop.f32.mrf.mxu0  ;;  %v684_v31 = vpop.f32.mrf.mxu1 }
 0x142   :  { %1160 = vst [vmem:[#allocation7 + $0x78] sm:$0xff] %v1354_v28  ;;  %1192 = vst [vmem:[#allocation7 + $0x178] sm:$0xff] %v1386_v29  ;;  %v525_v34 = vadd.f32 %v524_v30, %v1623_v55  ;;  %v685_v35 = vadd.f32 %v684_v31, %v1623_v55 }
 0x143   :  { %v526_v36 = vpop.f32.mrf.mxu0  ;;  %v686_v37 = vpop.f32.mrf.mxu1 }
 0x144   :  { %v1355_v38 = vpack.c.bf16 %v525_v34, %v523_v32  ;;  %v1387_v39 = vpack.c.bf16 %v685_v35, %v683_v33  ;;  %v527_v42 = vadd.f32 %v526_v36, %v1621_v54  ;;  %v687_v43 = vadd.f32 %v686_v37, %v1621_v54 }
 0x145   :  { %v528_v40 = vpop.f32.mrf.mxu0  ;;  %v688_v41 = vpop.f32.mrf.mxu1 }
 0x146   :  { %1161 = vst [vmem:[#allocation7 + $0x80] sm:$0xff] %v1355_v38  ;;  %1193 = vst [vmem:[#allocation7 + $0x180] sm:$0xff] %v1387_v39  ;;  %v529_v44 = vadd.f32 %v528_v40, %v1623_v55  ;;  %v689_v45 = vadd.f32 %v688_v41, %v1623_v55 }
 0x147   :  { %v532_v46 = vpop.f32.mrf.mxu0  ;;  %v692_v47 = vpop.f32.mrf.mxu1 }
 0x148   :  { %v1356_v48 = vpack.c.bf16 %v529_v44, %v527_v42  ;;  %v1388_v49 = vpack.c.bf16 %v689_v45, %v687_v43  ;;  %v533_v52 = vadd.f32 %v532_v46, %v1621_v54  ;;  %v693_v53 = vadd.f32 %v692_v47, %v1621_v54 }
 0x149   :  { %v534_v50 = vpop.f32.mrf.mxu0  ;;  %v694_v51 = vpop.f32.mrf.mxu1 }
 0x14a   :  { %1162 = vst [vmem:[#allocation7 + $0x88] sm:$0xff] %v1356_v48  ;;  %1194 = vst [vmem:[#allocation7 + $0x188] sm:$0xff] %v1388_v49  ;;  %v535_v56 = vadd.f32 %v534_v50, %v1623_v55  ;;  %v695_v57 = vadd.f32 %v694_v51, %v1623_v55 }
 0x14b   :  { %v536_v58 = vpop.f32.mrf.mxu0  ;;  %v696_v59 = vpop.f32.mrf.mxu1 }
 0x14c   :  { %v1357_v60 = vpack.c.bf16 %v535_v56, %v533_v52  ;;  %v1389_v61 = vpack.c.bf16 %v695_v57, %v693_v53  ;;  %v537_v0 = vadd.f32 %v536_v58, %v1621_v54  ;;  %v697_v1 = vadd.f32 %v696_v59, %v1621_v54 }
 0x14d   :  { %v538_v62 = vpop.f32.mrf.mxu0  ;;  %v698_v63 = vpop.f32.mrf.mxu1 }
 0x14e   :  { %1163 = vst [vmem:[#allocation7 + $0x90] sm:$0xff] %v1357_v60  ;;  %1195 = vst [vmem:[#allocation7 + $0x190] sm:$0xff] %v1389_v61  ;;  %v539_v2 = vadd.f32 %v538_v62, %v1623_v55  ;;  %v699_v3 = vadd.f32 %v698_v63, %v1623_v55 }
 0x14f   :  { %v542_v4 = vpop.f32.mrf.mxu0  ;;  %v702_v5 = vpop.f32.mrf.mxu1 }
 0x150   :  { %v1358_v6 = vpack.c.bf16 %v539_v2, %v537_v0  ;;  %v1390_v7 = vpack.c.bf16 %v699_v3, %v697_v1  ;;  %v543_v10 = vadd.f32 %v542_v4, %v1621_v54  ;;  %v703_v11 = vadd.f32 %v702_v5, %v1621_v54 }
 0x151   :  { %v544_v8 = vpop.f32.mrf.mxu0  ;;  %v704_v9 = vpop.f32.mrf.mxu1 }
 0x152   :  { %1164 = vst [vmem:[#allocation7 + $0x98] sm:$0xff] %v1358_v6  ;;  %1196 = vst [vmem:[#allocation7 + $0x198] sm:$0xff] %v1390_v7  ;;  %v545_v12 = vadd.f32 %v544_v8, %v1623_v55  ;;  %v705_v13 = vadd.f32 %v704_v9, %v1623_v55 }
 0x153   :  { %v546_v14 = vpop.f32.mrf.mxu0  ;;  %v706_v15 = vpop.f32.mrf.mxu1 }
 0x154   :  { %v1359_v16 = vpack.c.bf16 %v545_v12, %v543_v10  ;;  %v1391_v17 = vpack.c.bf16 %v705_v13, %v703_v11  ;;  %v547_v20 = vadd.f32 %v546_v14, %v1621_v54  ;;  %v707_v21 = vadd.f32 %v706_v15, %v1621_v54 }
 0x155   :  { %v548_v18 = vpop.f32.mrf.mxu0  ;;  %v708_v19 = vpop.f32.mrf.mxu1 }
 0x156   :  { %1165 = vst [vmem:[#allocation7 + $0xa0] sm:$0xff] %v1359_v16  ;;  %1197 = vst [vmem:[#allocation7 + $0x1a0] sm:$0xff] %v1391_v17  ;;  %v549_v22 = vadd.f32 %v548_v18, %v1623_v55  ;;  %v709_v23 = vadd.f32 %v708_v19, %v1623_v55 }
 0x157   :  { %v552_v24 = vpop.f32.mrf.mxu0  ;;  %v712_v25 = vpop.f32.mrf.mxu1 }
 0x158   :  { %v1360_v26 = vpack.c.bf16 %v549_v22, %v547_v20  ;;  %v1392_v27 = vpack.c.bf16 %v709_v23, %v707_v21  ;;  %v553_v30 = vadd.f32 %v552_v24, %v1621_v54  ;;  %v713_v31 = vadd.f32 %v712_v25, %v1621_v54 }
 0x159   :  { %v554_v28 = vpop.f32.mrf.mxu0  ;;  %v714_v29 = vpop.f32.mrf.mxu1 }
 0x15a   :  { %1166 = vst [vmem:[#allocation7 + $0xa8] sm:$0xff] %v1360_v26  ;;  %1198 = vst [vmem:[#allocation7 + $0x1a8] sm:$0xff] %v1392_v27  ;;  %v555_v32 = vadd.f32 %v554_v28, %v1623_v55  ;;  %v715_v33 = vadd.f32 %v714_v29, %v1623_v55 }
 0x15b   :  { %v556_v34 = vpop.f32.mrf.mxu0  ;;  %v716_v35 = vpop.f32.mrf.mxu1 }
 0x15c   :  { %v1361_v36 = vpack.c.bf16 %v555_v32, %v553_v30  ;;  %v1393_v37 = vpack.c.bf16 %v715_v33, %v713_v31  ;;  %v557_v40 = vadd.f32 %v556_v34, %v1621_v54  ;;  %v717_v41 = vadd.f32 %v716_v35, %v1621_v54 }
 0x15d   :  { %v558_v38 = vpop.f32.mrf.mxu0  ;;  %v718_v39 = vpop.f32.mrf.mxu1 }
 0x15e   :  { %1167 = vst [vmem:[#allocation7 + $0xb0] sm:$0xff] %v1361_v36  ;;  %1199 = vst [vmem:[#allocation7 + $0x1b0] sm:$0xff] %v1393_v37  ;;  %v559_v42 = vadd.f32 %v558_v38, %v1623_v55  ;;  %v719_v43 = vadd.f32 %v718_v39, %v1623_v55 }
 0x15f   :  { %v562_v44 = vpop.f32.mrf.mxu0  ;;  %v722_v45 = vpop.f32.mrf.mxu1 }
 0x160   :  { %v1362_v46 = vpack.c.bf16 %v559_v42, %v557_v40  ;;  %v1394_v47 = vpack.c.bf16 %v719_v43, %v717_v41  ;;  %v563_v50 = vadd.f32 %v562_v44, %v1621_v54  ;;  %v723_v51 = vadd.f32 %v722_v45, %v1621_v54 }
 0x161   :  { %v564_v48 = vpop.f32.mrf.mxu0  ;;  %v724_v49 = vpop.f32.mrf.mxu1 }
 0x162   :  { %1168 = vst [vmem:[#allocation7 + $0xb8] sm:$0xff] %v1362_v46  ;;  %1200 = vst [vmem:[#allocation7 + $0x1b8] sm:$0xff] %v1394_v47  ;;  %v565_v52 = vadd.f32 %v564_v48, %v1623_v55  ;;  %v725_v53 = vadd.f32 %v724_v49, %v1623_v55 }
 0x163   :  { %v566_v56 = vpop.f32.mrf.mxu0  ;;  %v726_v57 = vpop.f32.mrf.mxu1 }
 0x164   :  { %v1363_v58 = vpack.c.bf16 %v565_v52, %v563_v50  ;;  %v1395_v59 = vpack.c.bf16 %v725_v53, %v723_v51  ;;  %v567_v62 = vadd.f32 %v566_v56, %v1621_v54  ;;  %v727_v63 = vadd.f32 %v726_v57, %v1621_v54 }
 0x165   :  { %v568_v60 = vpop.f32.mrf.mxu0  ;;  %v728_v61 = vpop.f32.mrf.mxu1 }
 0x166   :  { %1169 = vst [vmem:[#allocation7 + $0xc0] sm:$0xff] %v1363_v58  ;;  %1201 = vst [vmem:[#allocation7 + $0x1c0] sm:$0xff] %v1395_v59  ;;  %v569_v0 = vadd.f32 %v568_v60, %v1623_v55  ;;  %v729_v1 = vadd.f32 %v728_v61, %v1623_v55 }
 0x167   :  { %v572_v2 = vpop.f32.mrf.mxu0  ;;  %v732_v3 = vpop.f32.mrf.mxu1 }
 0x168   :  { %v1364_v4 = vpack.c.bf16 %v569_v0, %v567_v62  ;;  %v1396_v5 = vpack.c.bf16 %v729_v1, %v727_v63  ;;  %v573_v8 = vadd.f32 %v572_v2, %v1621_v54  ;;  %v733_v9 = vadd.f32 %v732_v3, %v1621_v54 }
 0x169   :  { %v574_v6 = vpop.f32.mrf.mxu0  ;;  %v734_v7 = vpop.f32.mrf.mxu1 }
 0x16a   :  { %1170 = vst [vmem:[#allocation7 + $0xc8] sm:$0xff] %v1364_v4  ;;  %1202 = vst [vmem:[#allocation7 + $0x1c8] sm:$0xff] %v1396_v5  ;;  %v575_v10 = vadd.f32 %v574_v6, %v1623_v55  ;;  %v735_v11 = vadd.f32 %v734_v7, %v1623_v55 }
 0x16b   :  { %v576_v12 = vpop.f32.mrf.mxu0  ;;  %v736_v13 = vpop.f32.mrf.mxu1 }
 0x16c   :  { %v1365_v14 = vpack.c.bf16 %v575_v10, %v573_v8  ;;  %v1397_v15 = vpack.c.bf16 %v735_v11, %v733_v9  ;;  %v577_v18 = vadd.f32 %v576_v12, %v1621_v54  ;;  %v737_v19 = vadd.f32 %v736_v13, %v1621_v54 }
 0x16d   :  { %v578_v16 = vpop.f32.mrf.mxu0  ;;  %v738_v17 = vpop.f32.mrf.mxu1 }
 0x16e   :  { %1171 = vst [vmem:[#allocation7 + $0xd0] sm:$0xff] %v1365_v14  ;;  %1203 = vst [vmem:[#allocation7 + $0x1d0] sm:$0xff] %v1397_v15  ;;  %v579_v20 = vadd.f32 %v578_v16, %v1623_v55  ;;  %v739_v21 = vadd.f32 %v738_v17, %v1623_v55 }
 0x16f   :  { %v582_v22 = vpop.f32.mrf.mxu0  ;;  %v742_v23 = vpop.f32.mrf.mxu1 }
 0x170   :  { %v1366_v24 = vpack.c.bf16 %v579_v20, %v577_v18  ;;  %v1398_v25 = vpack.c.bf16 %v739_v21, %v737_v19  ;;  %v583_v28 = vadd.f32 %v582_v22, %v1621_v54  ;;  %v743_v29 = vadd.f32 %v742_v23, %v1621_v54 }
 0x171   :  { %v584_v26 = vpop.f32.mrf.mxu0  ;;  %v744_v27 = vpop.f32.mrf.mxu1 }
 0x172   :  { %1172 = vst [vmem:[#allocation7 + $0xd8] sm:$0xff] %v1366_v24  ;;  %1204 = vst [vmem:[#allocation7 + $0x1d8] sm:$0xff] %v1398_v25  ;;  %v585_v30 = vadd.f32 %v584_v26, %v1623_v55  ;;  %v745_v31 = vadd.f32 %v744_v27, %v1623_v55 }
 0x173   :  { %v586_v32 = vpop.f32.mrf.mxu0  ;;  %v746_v33 = vpop.f32.mrf.mxu1 }
 0x174   :  { %v1367_v34 = vpack.c.bf16 %v585_v30, %v583_v28  ;;  %v1399_v35 = vpack.c.bf16 %v745_v31, %v743_v29  ;;  %v587_v38 = vadd.f32 %v586_v32, %v1621_v54  ;;  %v747_v39 = vadd.f32 %v746_v33, %v1621_v54 }
 0x175   :  { %v588_v36 = vpop.f32.mrf.mxu0  ;;  %v748_v37 = vpop.f32.mrf.mxu1 }
 0x176   :  { %1173 = vst [vmem:[#allocation7 + $0xe0] sm:$0xff] %v1367_v34  ;;  %1205 = vst [vmem:[#allocation7 + $0x1e0] sm:$0xff] %v1399_v35  ;;  %v589_v40 = vadd.f32 %v588_v36, %v1623_v55  ;;  %v749_v41 = vadd.f32 %v748_v37, %v1623_v55 }
 0x177   :  { %v592_v42 = vpop.f32.mrf.mxu0  ;;  %v752_v43 = vpop.f32.mrf.mxu1 }
 0x178   :  { %v1368_v44 = vpack.c.bf16 %v589_v40, %v587_v38  ;;  %v1400_v45 = vpack.c.bf16 %v749_v41, %v747_v39  ;;  %v593_v48 = vadd.f32 %v592_v42, %v1621_v54  ;;  %v753_v49 = vadd.f32 %v752_v43, %v1621_v54 }
 0x179   :  { %v594_v46 = vpop.f32.mrf.mxu0  ;;  %v754_v47 = vpop.f32.mrf.mxu1 }
 0x17a   :  { %1174 = vst [vmem:[#allocation7 + $0xe8] sm:$0xff] %v1368_v44  ;;  %1206 = vst [vmem:[#allocation7 + $0x1e8] sm:$0xff] %v1400_v45  ;;  %v595_v50 = vadd.f32 %v594_v46, %v1623_v55  ;;  %v755_v51 = vadd.f32 %v754_v47, %v1623_v55 }
 0x17b   :  { %v596_v52 = vpop.f32.mrf.mxu0  ;;  %v756_v53 = vpop.f32.mrf.mxu1 }
 0x17c   :  { %v1369_v56 = vpack.c.bf16 %v595_v50, %v593_v48  ;;  %v1401_v57 = vpack.c.bf16 %v755_v51, %v753_v49  ;;  %v597_v60 = vadd.f32 %v596_v52, %v1621_v54  ;;  %v757_v61 = vadd.f32 %v756_v53, %v1621_v54 }
 0x17d   :  { %v598_v58 = vpop.f32.mrf.mxu0  ;;  %v758_v59 = vpop.f32.mrf.mxu1 }
 0x17e   :  { %1175 = vst [vmem:[#allocation7 + $0xf0] sm:$0xff] %v1369_v56  ;;  %1207 = vst [vmem:[#allocation7 + $0x1f0] sm:$0xff] %v1401_v57  ;;  %v599_v62 = vadd.f32 %v598_v58, %v1623_v55  ;;  %v759_v63 = vadd.f32 %v758_v59, %v1623_v55 }
 0x180   :  { %v1370_v0 = vpack.c.bf16 %v599_v62, %v597_v60  ;;  %v1402_v1 = vpack.c.bf16 %v759_v63, %v757_v61 }
 0x182   :  { %1176 = vst [vmem:[#allocation7 + $0xf8] sm:$0xff] %v1370_v0  ;;  %1208 = vst [vmem:[#allocation7 + $0x1f8] sm:$0xff] %v1402_v1 }
 0x183   :  { %1534 = shalt.err (!%p1531_p0)
}
 0x184   :  { %1220 = dma.vmem_to_hbm [thread:$0]  %s1215_s26, 8192, %s1762_s3, [#allocation4], %s1553_s22, %s1553_s22, %s1554_s23  }
 0x185   :  { %1547 = dma.done.wait [#allocation4], 8192  }
 0x186   :  { %1548 = vsyncadd [#allocation4], 4294959104 }
 0x187   :  { %1224 = vsyncpa [#allocation3], 1 }
 0x188   :  { %1225 = vsyncpa [#allocation6], 1 }
 0x189   :  { %1226 = vsyncpa [#allocation4], 1 }

</bundles_post_ra>
